<compile_context>
chip_gen: v7x
topology: tpu7x:2x2x1
jax: 0.10.0
libtpu: 0.0.40
codegen_flags: <defaults>
</compile_context>

<pallas_src>
import jax
import jax.numpy as jnp
from jax.experimental import pallas as pl
from jax.experimental.pallas import tpu as pltpu

_LANES = 128


def _round_up(v, m):
    return ((v + m - 1) // m) * m


def _splat_kernel(inv_s_ref, o_ref):
    # inv_s_ref: SMEM scalar holder, shape (1,), float32 (precomputed exp(10*var))
    # o_ref:     VMEM output block, shape (block_rows, 128), float32
    # Pure broadcast-store: no load of the (uninitialized) output, no vmul.
    o_ref[...] = jnp.full(o_ref.shape, inv_s_ref[0], dtype=o_ref.dtype)


def variance_network_forward(x, variance, *, block_rows=1024, use_pallas=None):
    """x: (N, ...) array (only len(x) is used); variance: scalar float32 param.

    Returns (N, 1) float32 = ones * exp(variance * 10.0).

    use_pallas: True / False / None (None = auto: use the kernel only when N is
    large enough to amortize the pallas_call fixed cost).
    """
    n = int(x.shape[0])
    # Hoisted scalar math: one exp in the wrapper instead of per-grid-step EUP work.
    inv_s = jnp.exp(jnp.asarray(variance, dtype=jnp.float32) * 10.0)
    # TODO(synk): modulate/clamp_max(mod_val) branch of `inv_s` is training-time
    # state (update_step / do_mod); not part of the default (modulate=False) forward.

    if use_pallas is None:
        use_pallas = n >= 4096
    if not use_pallas or n == 0:
        # Tiny-N fast path: XLA already emits an optimal fused splat.
        return jnp.full((n, 1), inv_s, dtype=jnp.float32)

    # Lane-dense slab layout: N scalars packed as (rows_pad, 128) f32.
    rows = pl.cdiv(n, _LANES)
    br = min(block_rows, _round_up(rows, 8))      # block rows, multiple of 8
    rows_pad = _round_up(rows, br)
    grid = (rows_pad // br,)

    slab = pl.pallas_call(
        _splat_kernel,
        out_shape=jax.ShapeDtypeStruct((rows_pad, _LANES), jnp.float32),
        grid=grid,
        in_specs=[pl.BlockSpec(memory_space=pltpu.SMEM)],
        out_specs=pl.BlockSpec((br, _LANES), lambda i: (i, 0)),
        compiler_params=pltpu.CompilerParams(
            dimension_semantics=("parallel",)),
    )(inv_s.reshape((1,)))

    # Unpack the lane-dense slab back to the module's (N, 1) output.
    return slab.reshape(-1)[:n].reshape(n, 1)


if __name__ == "__main__":
    key = jax.random.PRNGKey(0)
    # Small shapes consistent with the module: x is a batch of ray/point
    # features; only len(x) matters.
    N, D = 8, 32
    x = jax.random.normal(key, (N, D), dtype=jnp.float32)

    # Deterministic parameter init: config.init_val = 0.3 (typical NeuS value).
    variance = jnp.float32(0.3)

    # Force the Pallas path so the kernel is exercised once (auto-dispatch
    # would use the XLA splat fast path at this tiny N).
    out = variance_network_forward(x, variance, use_pallas=True)
    out = jax.block_until_ready(out)

    # Reference check in plain JAX.
    ref = jnp.ones((N, 1), jnp.float32) * jnp.exp(variance * 10.0)
    assert out.shape == (N, 1), out.shape
    assert out.dtype == jnp.float32, out.dtype
    assert jnp.allclose(out, ref, rtol=1e-6, atol=1e-6), (out, ref)

    # Also sanity-check a larger N that spans multiple grid steps.
    N2 = 5000
    x2 = jnp.zeros((N2, D), jnp.float32)
    out2 = jax.block_until_ready(
        variance_network_forward(x2, variance, block_rows=16, use_pallas=True))
    ref2 = jnp.full((N2, 1), jnp.exp(variance * 10.0), jnp.float32)
    assert out2.shape == (N2, 1), out2.shape
    assert jnp.allclose(out2, ref2, rtol=1e-6, atol=1e-6)

    print("KERNEL_OK")
</pallas_src>

<mosaic_0001>
module attributes {stable_mosaic.version = 11 : i64} {
  func.func @_splat_kernel(%arg0: i32, %arg1: memref<1xf32, #tpu.memory_space<smem>>, %arg2: memref<8x128xf32, #tpu.memory_space<vmem>>) attributes {dimension_semantics = [#tpu.dimension_semantics<parallel>], iteration_bounds = array<i64: 1>, scalar_prefetch = 0 : i64, scratch_operands = 0 : i64, tpu.core_type = #tpu.core_type<tc>, window_params = [{transform_indices = @transform_0, window_bounds = array<i64: 1>}, {transform_indices = @transform_1, window_bounds = array<i64: 8, 128>}]} {
    %c0 = arith.constant 0 : index
    %0 = memref.load %arg1[%c0] : memref<1xf32, #tpu.memory_space<smem>>
    %1 = vector.broadcast %0 : f32 to vector<8x128xf32>
    %c0_0 = arith.constant 0 : index
    %c0_1 = arith.constant 0 : index
    %2 = vector.load %arg2[%c0_0, %c0_1] : memref<8x128xf32, #tpu.memory_space<vmem>>, vector<8x128xf32>
    tpu.vector_store %arg2[%c0_0, %c0_1], %1 {strides = array<i32>} : memref<8x128xf32, #tpu.memory_space<vmem>>, vector<8x128xf32>,
    return
  }
  func.func @transform_0(%arg0: i32) -> i32 {
    %c0_i32 = arith.constant 0 : i32
    %c0_i32_0 = arith.constant 0 : i32
    return %c0_i32 : i32
  }
  func.func @transform_1(%arg0: i32) -> (i32, i32) {
    %c0_i32 = arith.constant 0 : i32
    %c0_i32_0 = arith.constant 0 : i32
    return %arg0, %c0_i32 : i32, i32
  }
}

</mosaic_0001>

<bundles_post_ra>
// kernel: tpu_custom_call.1
= control target key start
LH: loop header
LB: loop body
LE: loop exit
PB: predicated region body
PF: predicated region fallthrough
CT: control target
= control target key end

     0   :  { %s78_s0 = inlined_call_operand.<no memory space> [shape: f32[1], index: 0, kind: input, shape index: {}]   ;;  %s79_s1 = inlined_call_operand.hbm [shape: f32[8,128], index: 1, kind: output, shape index: {}]  }
   0x1   :  { %v11_v0 = vstv %s78_s0 }
   0x2   :  { %7 = vsyncpa [#allocation4], 0  ;;  %12 = vst [vmem:[#allocation3] sm:$0xff] %v11_v0  ;;  %s52_s8 = smov [#allocation3]  }
   0x3   :  { %s19_s9 = sshll.u32 %s52_s8, 4  ;;  %s20_s9 = int_to_ptr.vmem [resolvable:$true] %s19_s9 }
   0x4   :  { %s28_s10 = scalar_lea.vmem %s20_s9, 128  ;;  %p33_p1 = scmp.lt.s32.totalorder %s20_s9, %s20_s9 }
   0x5   :  { %p29_p0 = scmp.ne.s32.totalorder %s20_s9, %s28_s10  ;;  %p34_p2 = scmp.lt.s32.totalorder %s28_s10, %s28_s10 }
   0x7   :  { %p35_p3 = por %p34_p2, %p33_p1 }
   0x9   :  { %p36_p4 = pnand %p35_p3, %p29_p0 }
   0xb   :  { %39 = shalt.err (!%p36_p4)
}
   0xc   :  { %s40_s13 = scalar_lea.hbm %s79_s1, 128 }
   0xd   :  { %p41_p5 = scmp.ne.s32.totalorder %s79_s1, %s40_s13  ;;  %p44_p6 = scmp.lt.u32.totalorder %s40_s13, %s79_s1 }
   0xf   :  { %p46_p7 = pnand %p44_p6, %p41_p5 }
  0x11   :  { %49 = shalt.err (!%p46_p7)
}
  0x12   :  { %22 = dma.vmem_to_hbm [thread:$0]  %s20_s9, 128, %s79_s1, [#allocation4]  }
  0x13   :  { %50 = dma.done.wait [#allocation4], 128  }
  0x14   :  { %51 = vsyncadd [#allocation4], 4294967168 }
  0x15   :  { %26 = vsyncpa [#allocation4], 1 }

</bundles_post_ra>
